<compile_context>
chip_gen: v7x
topology: tpu7x:2x2x1
jax: 0.10.0
libtpu: 0.0.40
codegen_flags: <defaults>
</compile_context>

<pallas_src>
import math

import jax
import jax.numpy as jnp
from jax.experimental import pallas as pl
from jax.experimental.pallas import tpu as pltpu

LOG2PI = math.log(2.0 * math.pi)


def make_vae_kernel(Z, beta):
    beta = float(beta)

    def kernel(x_ref, eps_ref, wenc_ref, benc_ref, wdec_ref, bdec_ref, out_ref):
        xf = x_ref[...]                              # [TB, D] f32 (full precision residual)
        xb = xf.astype(jnp.bfloat16)                 # cast for the MXU only (in-kernel, free)

        # --- fused mu/logvar head: one MXU pass -> [TB, 2Z], f32 accumulation ---
        y = jnp.dot(xb, wenc_ref[...],
                    preferred_element_type=jnp.float32) + benc_ref[...]
        mu = y[:, :Z]                                # [TB, Z] f32
        logvar = y[:, Z:]                            # [TB, Z] f32

        # --- reparameterized sample (getSample): fresh upstream noise ---
        z = mu + jnp.exp(0.5 * logvar) * eps_ref[...]          # [TB, Z] f32

        # --- Generative: xhat = z @ Wdec + bdec (bf16 MXU inputs, f32 accumulate) ---
        xhat = jnp.dot(z.astype(jnp.bfloat16), wdec_ref[...],
                       preferred_element_type=jnp.float32) + bdec_ref[...]   # [TB, D] f32

        # Variable part of -ELBO for this tile:
        #   0.5*[ sum (x-xhat)^2 + beta*sum z^2 - beta*sum logvar ]
        r_d = jnp.sum((xf - xhat) ** 2, axis=-1, keepdims=True)              # [TB, 1]
        r_z = jnp.sum(beta * (z * z - logvar), axis=-1, keepdims=True)       # [TB, 1]
        out_ref[...] = (0.5 * jnp.sum(r_d + r_z)).reshape(1, 1, 1)

    return kernel


def fuse_params(params):
    """Done once: concat mu/logvar heads and cast matmul weights to bf16 (biases stay f32)."""
    wmu, bmu, wlv, blv, wdec, bdec = params
    w_enc = jnp.concatenate([wmu, wlv], axis=1).astype(jnp.bfloat16)   # [D, 2Z]
    b_enc = jnp.concatenate([bmu, blv], axis=1).astype(jnp.float32)    # [1, 2Z]
    w_dec = wdec.astype(jnp.bfloat16)                                  # [Z, D]
    b_dec = bdec.astype(jnp.float32)                                   # [1, D]
    return w_enc, b_enc, w_dec, b_dec


def _pick_batch_tile(B, cap=1024):
    """Few, large batch tiles; prefer exactly 2 tiles so the 'parallel' grid axis can occupy
    both TensorCores on v7x (costs only one extra ~0.35us grid step on v5e/v6e)."""
    half = B // 2
    if B % 2 == 0 and half % 8 == 0 and half <= cap:
        return half
    if B <= cap:
        return B
    tb = cap
    while tb > 8 and B % tb:
        tb -= 8
    return tb if B % tb == 0 else B


def vae_forward(x, fused_params, noise_key, beta=1.0, tile_b=None):
    """x: [B, D] f32, fused_params: (W_enc, b_enc, W_dec, b_dec), noise_key: jax PRNG key."""
    B, D = x.shape
    w_enc, b_enc, w_dec, b_dec = fused_params
    Z = w_dec.shape[0]

    TB = _pick_batch_tile(B) if tile_b is None else tile_b
    assert B % TB == 0, "batch must be divisible by the batch tile"
    num_tiles = B // TB

    # Fresh reparameterization noise (drawn upstream; in-kernel TPU PRNG has no interpret
    # lowering).  One [B, Z] f32 array, DMA'd tile by tile alongside x.
    eps = jax.random.normal(noise_key, (B, Z), jnp.float32)

    # Trace-time constants of the negative ELBO, added once outside the kernel:
    #   -beta*0.5*B*Z*(1+log2pi)  (entropy const)
    #   +0.5*B*D*log2pi           (emission const)
    #   +beta*0.5*B*Z*log2pi      (prior const)
    const = 0.5 * B * D * LOG2PI - 0.5 * float(beta) * B * Z

    partials = pl.pallas_call(
        make_vae_kernel(Z, beta),
        out_shape=jax.ShapeDtypeStruct((num_tiles, 1, 1), jnp.float32),
        grid=(num_tiles,),
        in_specs=[
            pl.BlockSpec((TB, D), lambda i: (i, 0)),          # x tile (f32)
            pl.BlockSpec((TB, Z), lambda i: (i, 0)),          # eps tile (f32)
            pl.BlockSpec((D, 2 * Z), lambda i: (0, 0)),       # fused encoder weight (bf16)
            pl.BlockSpec((1, 2 * Z), lambda i: (0, 0)),       # fused encoder bias (f32)
            pl.BlockSpec((Z, D), lambda i: (0, 0)),           # decoder weight (bf16)
            pl.BlockSpec((1, D), lambda i: (0, 0)),           # decoder bias (f32)
        ],
        out_specs=pl.BlockSpec((1, 1, 1), lambda i: (i, 0, 0)),   # per-tile partial scalar
        compiler_params=pltpu.CompilerParams(
            # tiles are independent (each writes its own output block) -> parallel, so the
            # second TensorCore on v7x picks up half the tiles; sequential loop on v5e/v6e.
            dimension_semantics=("parallel",)),
    )(x, eps, w_enc, b_enc, w_dec, b_dec)

    return jnp.sum(partials) + const


def init_params(key, D, Z):
    """Deterministic synthetic parameters (no checkpoint loading)."""
    k1, k2, k3 = jax.random.split(key, 3)
    wmu = 0.05 * jax.random.normal(k1, (D, Z), jnp.float32)
    bmu = jnp.zeros((1, Z), jnp.float32)
    wlv = 0.05 * jax.random.normal(k2, (D, Z), jnp.float32)
    blv = jnp.full((1, Z), -1.0, jnp.float32)          # start with small posterior variance
    wdec = 0.05 * jax.random.normal(k3, (Z, D), jnp.float32)
    bdec = jnp.zeros((1, D), jnp.float32)
    return (wmu, bmu, wlv, blv, wdec, bdec)


if __name__ == "__main__":
    # Lane/sublane-aligned small shapes: D and 2Z are multiples of 128; the batch splits into
    # 2 x 128-row tiles so the parallel grid axis can use both TensorCores on v7x.
    B, D, Z = 256, 256, 128

    key = jax.random.PRNGKey(0)
    kx, kp, ke = jax.random.split(key, 3)
    x = jax.random.normal(kx, (B, D), jnp.float32)
    params = init_params(kp, D, Z)
    fused = fuse_params(params)        # mu/logvar fusion + bf16 weight cast done once

    out = vae_forward(x, fused, noise_key=ke, beta=1.0)
    out = jax.block_until_ready(out)

    assert out.shape == () and out.dtype == jnp.float32
    assert bool(jnp.isfinite(out))
    print("KERNEL_OK")
</pallas_src>

<mosaic_0001>
module attributes {stable_mosaic.version = 11 : i64} {
  func.func @kernel(%arg0: i32, %arg1: memref<128x256xf32, #tpu.memory_space<vmem>>, %arg2: memref<128x128xf32, #tpu.memory_space<vmem>>, %arg3: memref<256x256xbf16, #tpu.memory_space<vmem>>, %arg4: memref<1x256xf32, #tpu.memory_space<vmem>>, %arg5: memref<128x256xbf16, #tpu.memory_space<vmem>>, %arg6: memref<1x256xf32, #tpu.memory_space<vmem>>, %arg7: memref<1x1x1xf32, #tpu.memory_space<vmem>>) attributes {dimension_semantics = [#tpu.dimension_semantics<parallel>], iteration_bounds = array<i64: 2>, scalar_prefetch = 0 : i64, scratch_operands = 0 : i64, tpu.core_type = #tpu.core_type<tc>, window_params = [{transform_indices = @transform_0, window_bounds = array<i64: 128, 256>}, {transform_indices = @transform_1, window_bounds = array<i64: 128, 128>}, {pipeline_mode = #tpu.pipeline_mode<synchronous>, transform_indices = @transform_2, window_bounds = array<i64: 256, 256>}, {pipeline_mode = #tpu.pipeline_mode<synchronous>, transform_indices = @transform_3, window_bounds = array<i64: 1, 256>}, {pipeline_mode = #tpu.pipeline_mode<synchronous>, transform_indices = @transform_4, window_bounds = array<i64: 128, 256>}, {pipeline_mode = #tpu.pipeline_mode<synchronous>, transform_indices = @transform_5, window_bounds = array<i64: 1, 256>}, {transform_indices = @transform_6, window_bounds = array<i64: 1, 1, 1>}]} {
    %c0 = arith.constant 0 : index
    %c0_0 = arith.constant 0 : index
    %0 = vector.load %arg1[%c0, %c0_0] : memref<128x256xf32, #tpu.memory_space<vmem>>, vector<128x256xf32>
    %1 = arith.truncf %0 : vector<128x256xf32> to vector<128x256xbf16>
    %c0_1 = arith.constant 0 : index
    %c0_2 = arith.constant 0 : index
    %2 = vector.load %arg3[%c0_1, %c0_2] : memref<256x256xbf16, #tpu.memory_space<vmem>>, vector<256x256xbf16>
    %cst = arith.constant dense<0.000000e+00> : vector<128x256xf32>
    %3 = tpu.matmul %1, %2, %cst {dimension_numbers = #tpu.dot_dimension_numbers<[1], [0], [0], [1], [0, 0, 1, 1], [], []>} : vector<128x256xbf16>, vector<256x256xbf16>, vector<128x256xf32> -> vector<128x256xf32>
    %c0_3 = arith.constant 0 : index
    %c0_4 = arith.constant 0 : index
    %4 = vector.load %arg4[%c0_3, %c0_4] : memref<1x256xf32, #tpu.memory_space<vmem>>, vector<1x256xf32>
    %5 = vector.broadcast %4 : vector<1x256xf32> to vector<128x256xf32>
    %6 = arith.addf %3, %5 : vector<128x256xf32>
    %7 = vector.extract_strided_slice %6 {offsets = [0, 0], sizes = [128, 128], strides = [1, 1]} : vector<128x256xf32> to vector<128x128xf32>
    %8 = vector.extract_strided_slice %6 {offsets = [0, 128], sizes = [128, 128], strides = [1, 1]} : vector<128x256xf32> to vector<128x128xf32>
    %cst_5 = arith.constant 5.000000e-01 : f32
    %9 = vector.broadcast %cst_5 : f32 to vector<128x128xf32>
    %10 = arith.mulf %9, %8 : vector<128x128xf32>
    %11 = math.exp %10 : vector<128x128xf32>
    %c0_6 = arith.constant 0 : index
    %c0_7 = arith.constant 0 : index
    %12 = vector.load %arg2[%c0_6, %c0_7] : memref<128x128xf32, #tpu.memory_space<vmem>>, vector<128x128xf32>
    %13 = arith.mulf %11, %12 : vector<128x128xf32>
    %14 = arith.addf %7, %13 : vector<128x128xf32>
    %15 = arith.truncf %14 : vector<128x128xf32> to vector<128x128xbf16>
    %c0_8 = arith.constant 0 : index
    %c0_9 = arith.constant 0 : index
    %16 = vector.load %arg5[%c0_8, %c0_9] : memref<128x256xbf16, #tpu.memory_space<vmem>>, vector<128x256xbf16>
    %cst_10 = arith.constant dense<0.000000e+00> : vector<128x256xf32>
    %17 = tpu.matmul %15, %16, %cst_10 {dimension_numbers = #tpu.dot_dimension_numbers<[1], [0], [0], [1], [0, 0, 1, 1], [], []>} : vector<128x128xbf16>, vector<128x256xbf16>, vector<128x256xf32> -> vector<128x256xf32>
    %c0_11 = arith.constant 0 : index
    %c0_12 = arith.constant 0 : index
    %18 = vector.load %arg6[%c0_11, %c0_12] : memref<1x256xf32, #tpu.memory_space<vmem>>, vector<1x256xf32>
    %19 = vector.broadcast %18 : vector<1x256xf32> to vector<128x256xf32>
    %20 = arith.addf %17, %19 : vector<128x256xf32>
    %21 = arith.subf %0, %20 : vector<128x256xf32>
    %22 = arith.mulf %21, %21 : vector<128x256xf32>
    %cst_13 = arith.constant dense<0.000000e+00> : vector<128xf32>
    %23 = vector.multi_reduction <add>, %22, %cst_13 [1] : vector<128x256xf32> to vector<128xf32>
    %24 = vector.shape_cast %23 : vector<128xf32> to vector<128x1xf32>
    %25 = arith.mulf %14, %14 : vector<128x128xf32>
    %26 = arith.subf %25, %8 : vector<128x128xf32>
    %cst_14 = arith.constant 1.000000e+00 : f32
    %27 = vector.broadcast %cst_14 : f32 to vector<128x128xf32>
    %28 = arith.mulf %27, %26 : vector<128x128xf32>
    %cst_15 = arith.constant dense<0.000000e+00> : vector<128xf32>
    %29 = vector.multi_reduction <add>, %28, %cst_15 [1] : vector<128x128xf32> to vector<128xf32>
    %30 = vector.shape_cast %29 : vector<128xf32> to vector<128x1xf32>
    %31 = arith.addf %24, %30 : vector<128x1xf32>
    %32 = vector.shape_cast %31 : vector<128x1xf32> to vector<1x128x1xf32>
    %cst_16 = arith.constant dense<0.000000e+00> : vector<1xf32>
    %33 = vector.multi_reduction <add>, %32, %cst_16 [1, 2] : vector<1x128x1xf32> to vector<1xf32>
    %34 = vector.shape_cast %33 : vector<1xf32> to vector<1x1x1xf32>
    %35 = vector.extract %34[0, 0, 0] : f32 from vector<1x1x1xf32>
    %cst_17 = arith.constant 5.000000e-01 : f32
    %36 = arith.mulf %cst_17, %35 : f32
    %37 = vector.broadcast %36 : f32 to vector<1x1x1xf32>
    %c0_18 = arith.constant 0 : index
    %c0_19 = arith.constant 0 : index
    %c0_20 = arith.constant 0 : index
    %38 = vector.load %arg7[%c0_18, %c0_19, %c0_20] : memref<1x1x1xf32, #tpu.memory_space<vmem>>, vector<1x1x1xf32>
    tpu.vector_store %arg7[%c0_18, %c0_19, %c0_20], %37 {strides = array<i32>} : memref<1x1x1xf32, #tpu.memory_space<vmem>>, vector<1x1x1xf32>,
    return
  }
  func.func @transform_0(%arg0: i32) -> (i32, i32) {
    %c0_i32 = arith.constant 0 : i32
    %c0_i32_0 = arith.constant 0 : i32
    return %arg0, %c0_i32 : i32, i32
  }
  func.func @transform_1(%arg0: i32) -> (i32, i32) {
    %c0_i32 = arith.constant 0 : i32
    %c0_i32_0 = arith.constant 0 : i32
    return %arg0, %c0_i32 : i32, i32
  }
  func.func @transform_2(%arg0: i32) -> (i32, i32) {
    %c0_i32 = arith.constant 0 : i32
    %c0_i32_0 = arith.constant 0 : i32
    %c0_i32_1 = arith.constant 0 : i32
    return %c0_i32, %c0_i32_0 : i32, i32
  }
  func.func @transform_3(%arg0: i32) -> (i32, i32) {
    %c0_i32 = arith.constant 0 : i32
    %c0_i32_0 = arith.constant 0 : i32
    %c0_i32_1 = arith.constant 0 : i32
    return %c0_i32, %c0_i32_0 : i32, i32
  }
  func.func @transform_4(%arg0: i32) -> (i32, i32) {
    %c0_i32 = arith.constant 0 : i32
    %c0_i32_0 = arith.constant 0 : i32
    %c0_i32_1 = arith.constant 0 : i32
    return %c0_i32, %c0_i32_0 : i32, i32
  }
  func.func @transform_5(%arg0: i32) -> (i32, i32) {
    %c0_i32 = arith.constant 0 : i32
    %c0_i32_0 = arith.constant 0 : i32
    %c0_i32_1 = arith.constant 0 : i32
    return %c0_i32, %c0_i32_0 : i32, i32
  }
  func.func @transform_6(%arg0: i32) -> (i32, i32, i32) {
    %c0_i32 = arith.constant 0 : i32
    %c0_i32_0 = arith.constant 0 : i32
    %c0_i32_1 = arith.constant 0 : i32
    return %arg0, %c0_i32, %c0_i32_0 : i32, i32, i32
  }
}

</mosaic_0001>

<bundles_post_ra>
// kernel: tpu_custom_call.1
= control target key start
LH: loop header
LB: loop body
LE: loop exit
PB: predicated region body
PF: predicated region fallthrough
CT: control target
= control target key end

     0   :  { %s2435_s0 = inlined_call_operand.hbm [shape: f32[256,256], index: 0, kind: input, shape index: {}]   ;;  %s2436_s1 = inlined_call_operand.hbm [shape: f32[256,128], index: 1, kind: input, shape index: {}]   ;;  %s2437_s2 = inlined_call_operand.hbm [shape: bf16[256,256], index: 2, kind: input, shape index: {}]   ;;  %s2438_s3 = inlined_call_operand.vmem [shape: f32[1,256], index: 3, kind: input, shape index: {}]   ;;  %s2439_s4 = inlined_call_operand.hbm [shape: bf16[128,256], index: 4, kind: input, shape index: {}]   ;;  %s2440_s5 = inlined_call_operand.vmem [shape: f32[1,256], index: 5, kind: input, shape index: {}]   ;;  %s2441_s6 = inlined_call_operand.vmem [shape: f32[2,1,1], index: 6, kind: output, shape index: {}]  }
   0x1   :  { %2455 = sst [smem:[#allocation17_spill]] %s2435_s0 }
   0x2   :  { %11 = vsyncpa [#allocation3], 0 }
   0x3   :  { %13 = vsyncpa [#allocation3 + $0x1], 0 }
   0x4   :  { %14 = vsyncpa [#allocation5], 0 }
   0x5   :  { %16 = vsyncpa [#allocation5 + $0x1], 0 }
   0x6   :  { %17 = vsyncpa [#allocation8], 0  ;;  %s1823_s21 = smov 0   ;;  %s1825_s22 = smov 0  }
   0x7   :  { %s1827_s23 = smov 0   ;;  %s1829_s24 = smov 0  }
   0x8 LB: > { %s1842_s25 = sadd.s32 4294967295, %s1777_s24   ;;  %p43_p0 = scmp.ne.s32.totalorder %s1769_s22, %s1765_s21  ;;  %s1777_s24 = sphi %s1829_s24, %s2483_s24   ;;  %s1773_s23 = sphi %s1827_s23, %s2482_s23   ;;  %s1769_s22 = sphi %s1825_s22, %s2481_s22   ;;  %s1765_s21 = sphi %s1823_s21, %s2480_s21  }
   0x9   : > { %p2442_p1 = scmp.eq.s32.totalorder %s1842_s25, 0  ;;  %p1370_p2 = scmp.ge.s32.totalorder %s1777_s24, 1 }
   0xa   : > { %p190_p3 = scmp.lt.s32.totalorder %s1777_s24, 3  ;;  %s1779_s28 = smov [#allocation6]  }
   0xb   : > { %p1850_p4 = por %p2442_p1, %p43_p0  ;;  %s202_s29 = sshll.u32 %s1779_s28, 4  ;;  %s203_s29 = int_to_ptr.vmem [resolvable:$true] %s202_s29 }
   0xc   : > { %p1854_p5 = pnand %p1370_p2, %p190_p3  ;;  %s1780_s7 = smov [#allocation7]  }
   0xd   : > { %s2456_s26 = scalar_select %p1850_p4, 1, 0 }
   0xe   : > { %s2457_s27 = scalar_select %p1854_p5, 1, 0 }
   0xf   : > { %p1453_p6 = pneg %p1854_p5  ;;  %s218_s8 = sshll.u32 %s1780_s7, 4  ;;  %s1866_s8 = int_to_ptr.vmem [resolvable:$true] %s218_s8 }
  0x10   : > { %s1615_s11 = scalar_lea.hbm %s2437_s2, 4096 }
  0x11   : > { %p1862_p7 = pnand %p1453_p6, %p2442_p1  ;;  %p1616_p8 = scmp.ne.s32.totalorder %s2437_s2, %s1615_s11 }
  0x12   : > { %p1622_p12 = scmp.lt.u32.totalorder %s1615_s11, %s2437_s2 }
  0x13   : > { %p1617_p9 = pneg %p1862_p7 }
  0x15   : > { %p1618_p10 = pnand %p1617_p9, %p1616_p8 }
  0x17   : > { %p1619_p11 = pneg %p1618_p10 }
  0x19   : > { %p1624_p13 = pnand %p1622_p12, %p1619_p11 }
  0x1b   : > { %1627 = shalt.err (!%p1624_p13)
}
  0x1c   : > { %s1628_s16 = scalar_lea.vmem %s203_s29, 4096  ;;  %p1636_p6 = scmp.lt.s32.totalorder %s203_s29, %s203_s29 }
  0x1d   : > { %p1629_p0 = scmp.ne.s32.totalorder %s203_s29, %s1628_s16  ;;  %p1637_p1 = scmp.lt.s32.totalorder %s1628_s16, %s1628_s16 }
  0x1f   : > { %p1631_p2 = pnand %p1629_p0, %p1617_p9  ;;  %p1638_p4 = por %p1637_p1, %p1636_p6 }
  0x21   : > { %p1632_p3 = pneg %p1631_p2 }
  0x23   : > { %p1639_p5 = pnand %p1638_p4, %p1632_p3 }
  0x25   : > { %1642 = shalt.err (!%p1639_p5)
}
  0x26   : > { %s2445_s17 = smov 128   ;;  %s2446_s18 = smov 8  }
  0x27   : > { %1456 = dma.hbm_to_vmem [thread:$0]  (!%p1862_p7), %s2437_s2, 4096, %s203_s29, [#allocation5], %s2445_s17, %s2445_s17, %s2446_s18  }
  0x28   : > { %s1643_s7 = scalar_lea.hbm %s2439_s4, 2048 }
  0x29   : > { %p1644_p1 = scmp.ne.s32.totalorder %s2439_s4, %s1643_s7  ;;  %p1650_p8 = scmp.lt.u32.totalorder %s1643_s7, %s2439_s4 }
  0x2b   : > { %p1646_p4 = pnand %p1644_p1, %p1617_p9 }
  0x2d   : > { %p1647_p5 = pneg %p1646_p4 }
  0x2f   : > { %p1652_p10 = pnand %p1650_p8, %p1647_p5 }
  0x31   : > { %1655 = shalt.err (!%p1652_p10)
}
  0x32   : > { %s1656_s29 = scalar_lea.vmem %s1866_s8, 2048  ;;  %p1664_p0 = scmp.lt.s32.totalorder %s1866_s8, %s1866_s8 }
  0x33   : > { %p1657_p11 = scmp.ne.s32.totalorder %s1866_s8, %s1656_s29  ;;  %p1665_p2 = scmp.lt.s32.totalorder %s1656_s29, %s1656_s29 }
  0x35   : > { %p1659_p12 = pnand %p1657_p11, %p1617_p9  ;;  %p1666_p3 = por %p1665_p2, %p1664_p0 }
  0x37   : > { %p1660_p13 = pneg %p1659_p12 }
  0x39   : > { %p1667_p6 = pnand %p1666_p3, %p1660_p13 }
  0x3b   : > { %1670 = shalt.err (!%p1667_p6)
}
  0x3c   : > { %1459 = dma.hbm_to_vmem [thread:$0]  (!%p1862_p7), %s2439_s4, 2048, %s1866_s8, [#allocation8], %s2445_s17, %s2445_s17, %s2446_s18  }
  0x3d   : > { %s1922_s15 = sadd.s32 1, %s1777_s24   ;;  %s30_s30 = sadd.s32 1, %s1773_s23 }
  0x3e   : > { %s27_s16 = ssub.s32 %s1777_s24, %s1922_s15  ;;  %p37_p9 = scmp.ne.s32.totalorder %s1773_s23, %s1769_s22 }
  0x3f   : > { %p28_p1 = scmp.eq.s32.totalorder %s27_s16, 0  ;;  %p38_p4 = scmp.eq.s32.totalorder %s1777_s24, 0 }
  0x40   : > { %p1469_p5 = scmp.lt.s32.totalorder %s1777_s24, 2  ;;  %s1932_s19 = sand.u32 1, %s1773_s23  }
  0x41   : > { %s1935_s20 = scalar_select %p28_p1, %s1773_s23, %s30_s30  }
  0x42   : > { %p39_p8 = por %p38_p4, %p37_p9  ;;  %s1374_s21 = sshll.u32 %s1932_s19, 8 }
  0x43   : > { %s1437_s28 = sshll.u32 %s1777_s24, 12  ;;  %s2459_s0 = sld [smem:[#allocation17_spill]] }
  0x44   : > { %s239_s10 = scalar_lea.vmem [#allocation2], %s1374_s21  ;;  %p1944_p7 = pnand %p1469_p5, %p39_p8 }
  0x45   : > { %s247_s11 = sshll.u32 %s239_s10, 4  ;;  %s236_s29 = scalar_lea.sflag [#allocation3], %s1932_s19  ;;  %s1948_s11 = int_to_ptr.vmem [resolvable:$true] %s247_s11 }
  0x46   : > { %p1673_p11 = pneg %p1944_p7 }
  0x49   : > { %s1942_s9 = scalar_lea.hbm %s2459_s0, %s1437_s28  ;;  %s1676_s16 = scalar_lea.hbm %s2459_s0, 8192 }
  0x4a   : > { %s1671_s13 = scalar_lea.hbm %s1942_s9, 4096  ;;  %p1677_p0 = scmp.lt.u32.totalorder %s1942_s9, %s2459_s0 }
  0x4b   : > { %p1672_p10 = scmp.ne.s32.totalorder %s1942_s9, %s1671_s13  ;;  %p1678_p2 = scmp.lt.u32.totalorder %s1676_s16, %s1671_s13 }
  0x4c   : > { %p1680_p6 = scmp.lt.u32.totalorder %s1671_s13, %s1942_s9 }
  0x4d   : > { %p1674_p12 = pnand %p1673_p11, %p1672_p10  ;;  %p1679_p3 = por %p1678_p2, %p1677_p0 }
  0x4f   : > { %p1675_p13 = pneg %p1674_p12  ;;  %p1681_p9 = por %p1680_p6, %p1679_p3 }
  0x51   : > { %p1682_p1 = pnand %p1681_p9, %p1675_p13 }
  0x53   : > { %1685 = shalt.err (!%p1682_p1)
}
  0x54   : > { %s1686_s7 = scalar_lea.vmem %s1948_s11, 4096  ;;  %s1783_s8 = smov [#allocation2]  }
  0x55   : > { %p1687_p4 = scmp.ne.s32.totalorder %s1948_s11, %s1686_s7  ;;  %s1691_s10 = sshll.u32 %s1783_s8, 4  ;;  %s1692_s10 = int_to_ptr.vmem [resolvable:$false] %s1691_s10 }
  0x56   : > { %s1693_s14 = scalar_lea.vmem %s1692_s10, 8192  ;;  %p1694_p10 = scmp.lt.s32.totalorder %s1948_s11, %s1692_s10 }
  0x57   : > { %p1689_p5 = pnand %p1687_p4, %p1673_p11  ;;  %p1695_p12 = scmp.lt.s32.totalorder %s1693_s14, %s1686_s7 }
  0x59   : > { %p1690_p8 = pneg %p1689_p5  ;;  %p1696_p0 = por %p1695_p12, %p1694_p10 }
  0x5b   : > { %p1697_p2 = pnand %p1696_p0, %p1690_p8 }
  0x5d   : > { %1700 = shalt.err (!%p1697_p2)
}
  0x5e   : > { %s1784_s13 = smov 256   ;;  %s1785_s30 = smov 16  }
  0x5f   : > { %1463 = dma.hbm_to_vmem [thread:$0]  (!%p1944_p7), %s1942_s9, 4096, %s1948_s11, %s236_s29, %s1784_s13, %s1784_s13, %s1785_s30  }
  0x60   : > { %s257_s16 = sand.u32 1, %s1777_s24   ;;  %s1378_s21 = sshll.u32 %s1932_s19, 7 }
  0x61   : > { %s1438_s28 = sshll.u32 %s1777_s24, 11  ;;  %s261_s7 = scalar_lea.vmem [#allocation4], %s1378_s21 }
  0x62   : > { %s268_s8 = sshll.u32 %s261_s7, 4  ;;  %s1984_s17 = scalar_lea.hbm %s2436_s1, %s1438_s28  ;;  %s1986_s8 = int_to_ptr.vmem [resolvable:$true] %s268_s8 }
  0x63   : > { %s1988_s18 = scalar_lea.sflag [#allocation5], %s257_s16  ;;  %s1701_s0 = scalar_lea.hbm %s1984_s17, 2048 }
  0x64   : > { %p1702_p13 = scmp.ne.s32.totalorder %s1984_s17, %s1701_s0  ;;  %s1706_s9 = scalar_lea.hbm %s2436_s1, 4096 }
  0x65   : > { %p1707_p9 = scmp.lt.u32.totalorder %s1984_s17, %s2436_s1  ;;  %p1708_p1 = scmp.lt.u32.totalorder %s1706_s9, %s1701_s0 }
  0x66   : > { %p1704_p3 = pnand %p1702_p13, %p1673_p11  ;;  %p1710_p5 = scmp.lt.u32.totalorder %s1701_s0, %s1984_s17 }
  0x67   : > { %p1709_p4 = por %p1708_p1, %p1707_p9 }
  0x68   : > { %p1705_p6 = pneg %p1704_p3 }
  0x69   : > { %p1711_p8 = por %p1710_p5, %p1709_p4 }
  0x6b   : > { %p1712_p10 = pnand %p1711_p8, %p1705_p6 }
  0x6d   : > { %1715 = shalt.err (!%p1712_p10)
}
  0x6e   : > { %s1716_s13 = scalar_lea.vmem %s1986_s8, 2048  ;;  %s1786_s30 = smov [#allocation4]  }
  0x6f   : > { %p1717_p12 = scmp.ne.s32.totalorder %s1986_s8, %s1716_s13  ;;  %s1721_s16 = sshll.u32 %s1786_s30, 4  ;;  %s1722_s16 = int_to_ptr.vmem [resolvable:$false] %s1721_s16 }
  0x70   : > { %s1723_s21 = scalar_lea.vmem %s1722_s16, 4096  ;;  %p1724_p13 = scmp.lt.s32.totalorder %s1986_s8, %s1722_s16 }
  0x71   : > { %p1719_p0 = pnand %p1717_p12, %p1673_p11  ;;  %p1725_p3 = scmp.lt.s32.totalorder %s1723_s21, %s1716_s13 }
  0x73   : > { %p1720_p2 = pneg %p1719_p0  ;;  %p1726_p9 = por %p1725_p3, %p1724_p13 }
  0x75   : > { %p1727_p1 = pnand %p1726_p9, %p1720_p2 }
  0x77   : > { %1730 = shalt.err (!%p1727_p1)
}
  0x78   : > { %s2461_s0 = smov 8   ;;  %s2462_s28 = smov 128  }
  0x79   : > { %1466 = dma.hbm_to_vmem [thread:$0]  (!%p1944_p7), %s1984_s17, 2048, %s1986_s8, %s1988_s18, %s2462_s28, %s2462_s28, %s2461_s0  }
  0x7a   : > { %p2463_p11 = scmp.ne.s32.totalorder %s2457_s27, 0 }
  0x7c   : > { %280 = sbr.rel (%p2463_p11) target bundleno = 1084 (0x43c), region = 44 }
  0x83   : > { %s282_s7 = sand.u32 1, %s1769_s22   ;;  %p2464_p6 = scmp.ne.s32.totalorder %s2456_s26, 0 }
  0x84   : > { %s1382_s10 = sshll.u32 %s282_s7, 8  ;;  %s283_s14 = scalar_lea.sflag [#allocation3], %s282_s7 }
  0x85   : > { %s2020_s24 = scalar_lea.vmem [#allocation2], %s1382_s10 }
  0x86   : > { %1748 = dma.done.wait (%p2464_p6), %s283_s14, 4096  }
  0x87   : > { %1750 = vsyncadd (%p2464_p6), %s283_s14, 4294963200  ;;  %s291_s12 = sand.u32 1, %s1842_s25   ;;  %s1383_s19 = sshll.u32 %s282_s7, 7 }
  0x88   : > { %s292_s17 = scalar_lea.sflag [#allocation5], %s291_s12  ;;  %s2027_s18 = scalar_lea.vmem [#allocation4], %s1383_s19 }
  0x89   : > { %1752 = dma.done.wait (%p2464_p6), %s292_s17, 2048  }
  0x8a   : > { %1754 = vsyncadd (%p2464_p6), %s292_s17, 4294965248  ;;  %p2465_p7 = scmp.eq.s32.totalorder %s1842_s25, 0 }
  0x8c   : > { %1756 = dma.done.wait (%p2465_p7), [#allocation5], 4096   ;;  %p2466_p4 = pmov %p2465_p7 }
  0x8e   : > { %1758 = vsyncadd (%p2466_p4), [#allocation5], 4294963200  ;;  %p2467_p5 = pmov %p2466_p4 }
  0x8f   : > { %p2468_p8 = pmov %p2466_p4 }
  0x90   : > { %1760 = dma.done.wait (%p2467_p5), [#allocation8], 2048  }
  0x91   : > { %1762 = vsyncadd (%p2468_p8), [#allocation8], 4294965248  ;;  %v1511_v0 = vld [vmem:[#allocation6 + $0x4] ss:$8 sps:$4 sm:$0xff]   ;;  %v1513_v1 = vld [vmem:[#allocation6] ss:$8 sps:$4 sm:$0xff]  }
  0x92   : > { %593 = vmatprep.subr.bf16.mxu0 %v1511_v0  ;;  %v1514_v2 = vld [vmem:[#allocation6 + $0x14] ss:$8 sps:$4 sm:$0xff]   ;;  %v1516_v3 = vld [vmem:[#allocation6 + $0x10] ss:$8 sps:$4 sm:$0xff]   ;;  %v1517_v4 = vld [vmem:[#allocation6 + $0x24] ss:$8 sps:$4 sm:$0xff]  }
  0x93   : > { %594 = vmatpush1.bf16.msra.mxu0 %v1513_v1  ;;  %v1519_v5 = vld [vmem:[#allocation6 + $0x20] ss:$8 sps:$4 sm:$0xff]   ;;  %v1520_v6 = vld [vmem:[#allocation6 + $0x34] ss:$8 sps:$4 sm:$0xff]   ;;  %v1522_v7 = vld [vmem:[#allocation6 + $0x30] ss:$8 sps:$4 sm:$0xff]  }
  0x94   : > { %595 = vmatprep.subr.bf16.mxu0 %v1514_v2  ;;  %v1523_v8 = vld [vmem:[#allocation6 + $0x44] ss:$8 sps:$4 sm:$0xff]   ;;  %v1525_v9 = vld [vmem:[#allocation6 + $0x40] ss:$8 sps:$4 sm:$0xff]   ;;  %v1526_v10 = vld [vmem:[#allocation6 + $0x54] ss:$8 sps:$4 sm:$0xff]  }
  0x95   : > { %v1528_v11 = vld [vmem:[#allocation6 + $0x50] ss:$8 sps:$4 sm:$0xff]   ;;  %v1529_v12 = vld [vmem:[#allocation6 + $0x64] ss:$8 sps:$4 sm:$0xff]   ;;  %v1531_v16 = vld [vmem:[#allocation6 + $0x60] ss:$8 sps:$4 sm:$0xff]  }
  0x96   : > { %v2042_v13 = vld [vmem:[%s2020_s24 + $0x8] sm:$0xff]  ;;  %v2045_v14 = vld [vmem:[%s2020_s24 + $0x18] sm:$0xff]  ;;  %v2050_v38 = vld [vmem:[%s2020_s24] sm:$0xff]  ;;  %vm1223_vm0 = vcmask 7168   ;;  %p337_p10 = scmp.lt.s32.totalorder %s1842_s25, 1  ;;  %vm1266_vm1 = vcmask 0  }
  0x97   : > { %596 = vmatpush1.bf16.msra.mxu0 %v1516_v3  ;;  %v374_v15 = vpack.c.bf16 %v2045_v14, %v2042_v13  ;;  %v1532_v17 = vld [vmem:[#allocation6 + $0x74] ss:$8 sps:$4 sm:$0xff]   ;;  %v1534_v18 = vld [vmem:[#allocation6 + $0x70] ss:$8 sps:$4 sm:$0xff]   ;;  %v1535_v19 = vld [vmem:[#allocation6 + $0x84] ss:$8 sps:$4 sm:$0xff]  }
  0x98   : > { %597 = vmatprep.subr.bf16.mxu0 %v1517_v4  ;;  %v1537_v20 = vld [vmem:[#allocation6 + $0x80] ss:$8 sps:$4 sm:$0xff]   ;;  %v1538_v21 = vld [vmem:[#allocation6 + $0x94] ss:$8 sps:$4 sm:$0xff]   ;;  %v1559_v22 = vld [vmem:[#allocation7 + $0x4] ss:$8 sps:$4 sm:$0xff]  }
  0x99   : > { %625 = vmatprep.mubr.bf16.mxu0 %v374_v15  ;;  %v1540_v23 = vld [vmem:[#allocation6 + $0x90] ss:$8 sps:$4 sm:$0xff]   ;;  %v1561_v24 = vld [vmem:[#allocation7] ss:$8 sps:$4 sm:$0xff]   ;;  %v1541_v25 = vld [vmem:[#allocation6 + $0xa4] ss:$8 sps:$4 sm:$0xff]   ;;  %918 = vmatprep.subr.bf16.mxu1 %v1559_v22 }
  0x9a   : > { %v1562_v26 = vld [vmem:[#allocation7 + $0x14] ss:$8 sps:$4 sm:$0xff]   ;;  %919 = vmatpush1.bf16.msra.mxu1 %v1561_v24  ;;  %v1543_v27 = vld [vmem:[#allocation6 + $0xa0] ss:$8 sps:$4 sm:$0xff]   ;;  %v1546_v29 = vld [vmem:[#allocation6 + $0xb0] ss:$8 sps:$4 sm:$0xff]  }
  0x9b   : > { %598 = vmatpush1.bf16.msra.mxu0 %v1519_v5  ;;  %920 = vmatprep.subr.bf16.mxu1 %v1562_v26  ;;  %v1544_v28 = vld [vmem:[#allocation6 + $0xb4] ss:$8 sps:$4 sm:$0xff]   ;;  %v1547_v30 = vld [vmem:[#allocation6 + $0xc4] ss:$8 sps:$4 sm:$0xff]   ;;  %v1549_v31 = vld [vmem:[#allocation6 + $0xc0] ss:$8 sps:$4 sm:$0xff]  }
  0x9c   : > { %599 = vmatprep.subr.bf16.mxu0 %v1520_v6  ;;  %v1550_v32 = vld [vmem:[#allocation6 + $0xd4] ss:$8 sps:$4 sm:$0xff]   ;;  %v1552_v33 = vld [vmem:[#allocation6 + $0xd0] ss:$8 sps:$4 sm:$0xff]   ;;  %v1553_v34 = vld [vmem:[#allocation6 + $0xe4] ss:$8 sps:$4 sm:$0xff]  }
  0x9d   : > { %v1555_v35 = vld [vmem:[#allocation6 + $0xe0] ss:$8 sps:$4 sm:$0xff]   ;;  %v1556_v36 = vld [vmem:[#allocation6 + $0xf4] ss:$8 sps:$4 sm:$0xff]   ;;  %v1558_v37 = vld [vmem:[#allocation6 + $0xf0] ss:$8 sps:$4 sm:$0xff]  }
  0x9e   : > { %v2053_v39 = vld [vmem:[%s2020_s24 + $0x10] sm:$0xff]  ;;  %v2056_v40 = vld [vmem:[%s2020_s24 + $0x28] sm:$0xff]  ;;  %v2059_v41 = vld [vmem:[%s2020_s24 + $0x38] sm:$0xff]  ;;  %s2485_s25 = smov (!%p337_p10, %s1842_s25), 1 }
  0x9f   : > { %600 = vmatpush1.bf16.msra.mxu0 %v1522_v7  ;;  %v373_v42 = vpack.c.bf16 %v2053_v39, %v2050_v38  ;;  %v376_v43 = vpack.c.bf16 %v2059_v41, %v2056_v40  ;;  %v2066_v44 = vld [vmem:[%s2020_s24 + $0x20] sm:$0xff]  ;;  %v2069_v45 = vld [vmem:[%s2020_s24 + $0x30] sm:$0xff]  ;;  %v2072_v46 = vld [vmem:[%s2020_s24 + $0x48] sm:$0xff]  ;;  %s339_s30 = scalar_lea.vmem %s2441_s6, %s2485_s25 }
  0xa0   : > { %601 = vmatprep.subr.bf16.mxu0 %v1523_v8  ;;  %v2075_v47 = vld [vmem:[%s2020_s24 + $0x58] sm:$0xff]  ;;  %v375_v48 = vpack.c.bf16 %v2069_v45, %v2066_v44  ;;  %v2082_v50 = vld [vmem:[%s2020_s24 + $0x40] sm:$0xff]  ;;  %v2085_v51 = vld [vmem:[%s2020_s24 + $0x50] sm:$0xff] }
  0xa1   : > { %v378_v49 = vpack.c.bf16 %v2075_v47, %v2072_v46  ;;  %v2088_v52 = vld [vmem:[%s2020_s24 + $0x68] sm:$0xff]  ;;  %v2091_v53 = vld [vmem:[%s2020_s24 + $0x78] sm:$0xff]  ;;  %v377_v54 = vpack.c.bf16 %v2085_v51, %v2082_v50  ;;  %v2098_v56 = vld [vmem:[%s2020_s24 + $0x60] sm:$0xff] }
  0xa2   : > { %v380_v55 = vpack.c.bf16 %v2091_v53, %v2088_v52  ;;  %v2101_v57 = vld [vmem:[%s2020_s24 + $0x70] sm:$0xff]  ;;  %v2104_v58 = vld [vmem:[%s2020_s24 + $0x88] sm:$0xff]  ;;  %v2107_v59 = vld [vmem:[%s2020_s24 + $0x98] sm:$0xff] }
  0xa3   : > { %602 = vmatpush1.bf16.msra.mxu0 %v1525_v9  ;;  %v379_v60 = vpack.c.bf16 %v2101_v57, %v2098_v56  ;;  %v382_v61 = vpack.c.bf16 %v2107_v59, %v2104_v58  ;;  %v2114_v62 = vld [vmem:[%s2020_s24 + $0x80] sm:$0xff]  ;;  %v2117_v63 = vld [vmem:[%s2020_s24 + $0x90] sm:$0xff]  ;;  %v2120_v0 = vld [vmem:[%s2020_s24 + $0xa8] sm:$0xff] }
  0xa4   : > { %603 = vmatprep.subr.bf16.mxu0 %v1526_v10  ;;  %v2123_v1 = vld [vmem:[%s2020_s24 + $0xb8] sm:$0xff]  ;;  %v381_v2 = vpack.c.bf16 %v2117_v63, %v2114_v62  ;;  %v2130_v4 = vld [vmem:[%s2020_s24 + $0xa0] sm:$0xff]  ;;  %v2133_v5 = vld [vmem:[%s2020_s24 + $0xb0] sm:$0xff] }
  0xa5   : > { %v384_v3 = vpack.c.bf16 %v2123_v1, %v2120_v0  ;;  %v2136_v6 = vld [vmem:[%s2020_s24 + $0xc8] sm:$0xff]  ;;  %v2139_v7 = vld [vmem:[%s2020_s24 + $0xd8] sm:$0xff]  ;;  %v383_v8 = vpack.c.bf16 %v2133_v5, %v2130_v4  ;;  %v2146_v10 = vld [vmem:[%s2020_s24 + $0xc0] sm:$0xff] }
  0xa6   : > { %v386_v9 = vpack.c.bf16 %v2139_v7, %v2136_v6  ;;  %v2155_v15 = vld [vmem:[%s2020_s24 + $0xf8] sm:$0xff]  ;;  %v1565_v22 = vld [vmem:[#allocation7 + $0x24] ss:$8 sps:$4 sm:$0xff]  }
  0xa7   : > { %604 = vmatpush1.bf16.msra.mxu0 %v1528_v11  ;;  %v2149_v11 = vld [vmem:[%s2020_s24 + $0xd0] sm:$0xff]  ;;  %2470 = vst [vmem:[#allocation14_spill] sm:$0xff] %v2155_v15  ;;  %v1571_v26 = vld [vmem:[#allocation7 + $0x44] ss:$8 sps:$4 sm:$0xff]  }
  0xa8   : > { %605 = vmatprep.subr.bf16.mxu0 %v1529_v12  ;;  %v2152_v12 = vld [vmem:[%s2020_s24 + $0xe8] sm:$0xff]  ;;  %v1568_v24 = vld [vmem:[#allocation7 + $0x34] ss:$8 sps:$4 sm:$0xff]  }
  0xa9   : > { %2469 = vst [vmem:[#allocation13_spill] sm:$0xff] %v2152_v12 }
  0xab   : > { %606 = vmatpush1.bf16.msra.mxu0 %v1531_v16  ;;  %v385_v16 = vpack.c.bf16 %v2149_v11, %v2146_v10 }
  0xac   : > { %607 = vmatprep.subr.bf16.mxu0 %v1532_v17  ;;  %v388_v17 = vpack.c.bf16 %v2155_v15, %v2152_v12 }
  0xaf   : > { %608 = vmatpush1.bf16.msra.mxu0 %v1534_v18  ;;  %v2162_v18 = vld [vmem:[%s2020_s24 + $0xe0] sm:$0xff] }
  0xb0   : > { %609 = vmatprep.subr.bf16.mxu0 %v1535_v19  ;;  %2471 = vst [vmem:[#allocation15_spill] sm:$0xff] %v2162_v18  ;;  %v2165_v19 = vld [vmem:[%s2020_s24 + $0xf0] sm:$0xff] }
  0xb1   : > { %2472 = vst [vmem:[#allocation16_spill] sm:$0xff] %v2165_v19 }
  0xb3   : > { %610 = vmatpush1.bf16.msra.mxu0 %v1537_v20  ;;  %v387_v20 = vpack.c.bf16 %v2165_v19, %v2162_v18 }
  0xb4   : > { %611 = vmatprep.subr.bf16.mxu0 %v1538_v21  ;;  %v1564_v21 = vld [vmem:[#allocation7 + $0x10] ss:$8 sps:$4 sm:$0xff]  }
  0xb5   : > { %921 = vmatpush1.bf16.msra.mxu1 %v1564_v21 }
  0xb6   : > { %922 = vmatprep.subr.bf16.mxu1 %v1565_v22 }
  0xb7   : > { %612 = vmatpush1.bf16.msra.mxu0 %v1540_v23  ;;  %v1567_v23 = vld [vmem:[#allocation7 + $0x20] ss:$8 sps:$4 sm:$0xff]  }
  0xb8   : > { %613 = vmatprep.subr.bf16.mxu0 %v1541_v25  ;;  %v1570_v25 = vld [vmem:[#allocation7 + $0x30] ss:$8 sps:$4 sm:$0xff]  }
  0xb9   : > { %923 = vmatpush1.bf16.msra.mxu1 %v1567_v23 }
  0xba   : > { %924 = vmatprep.subr.bf16.mxu1 %v1568_v24 }
  0xbb   : > { %614 = vmatpush1.bf16.msra.mxu0 %v1543_v27  ;;  %v1573_v27 = vld [vmem:[#allocation7 + $0x40] ss:$8 sps:$4 sm:$0xff]  }
  0xbc   : > { %615 = vmatprep.subr.bf16.mxu0 %v1544_v28  ;;  %v1574_v28 = vld [vmem:[#allocation7 + $0x54] ss:$8 sps:$4 sm:$0xff]  }
  0xbd   : > { %925 = vmatpush1.bf16.msra.mxu1 %v1570_v25 }
  0xbe   : > { %926 = vmatprep.subr.bf16.mxu1 %v1571_v26 }
  0xbf   : > { %616 = vmatpush1.bf16.msra.mxu0 %v1546_v29  ;;  %v1576_v29 = vld [vmem:[#allocation7 + $0x50] ss:$8 sps:$4 sm:$0xff]  }
  0xc0   : > { %617 = vmatprep.subr.bf16.mxu0 %v1547_v30  ;;  %v1577_v30 = vld [vmem:[#allocation7 + $0x64] ss:$8 sps:$4 sm:$0xff]  }
  0xc1   : > { %927 = vmatpush1.bf16.msra.mxu1 %v1573_v27 }
  0xc2   : > { %928 = vmatprep.subr.bf16.mxu1 %v1574_v28 }
  0xc3   : > { %618 = vmatpush1.bf16.msra.mxu0 %v1549_v31  ;;  %v1579_v31 = vld [vmem:[#allocation7 + $0x60] ss:$8 sps:$4 sm:$0xff]  }
  0xc4   : > { %619 = vmatprep.subr.bf16.mxu0 %v1550_v32  ;;  %v1580_v32 = vld [vmem:[#allocation7 + $0x74] ss:$8 sps:$4 sm:$0xff]  }
  0xc5   : > { %929 = vmatpush1.bf16.msra.mxu1 %v1576_v29 }
  0xc6   : > { %930 = vmatprep.subr.bf16.mxu1 %v1577_v30 }
  0xc7   : > { %620 = vmatpush1.bf16.msra.mxu0 %v1552_v33  ;;  %v1582_v33 = vld [vmem:[#allocation7 + $0x70] ss:$8 sps:$4 sm:$0xff]  }
  0xc8   : > { %621 = vmatprep.subr.bf16.mxu0 %v1553_v34  ;;  %v2449_v34 = vmov 0  }
  0xc9   : > { %931 = vmatpush1.bf16.msra.mxu1 %v1579_v31  ;;  %950 = vmatprep.mubr.bf16.mxu1 %v2449_v34  ;;  %v754_v31 = vld [vmem:[%s2027_s18] sm:$0xff] }
  0xca   : > { %932 = vmatprep.subr.bf16.mxu1 %v1580_v32 }
  0xcb   : > { %622 = vmatpush1.bf16.msra.mxu0 %v1555_v35  ;;  %v423_v35 = vlaneseq }
  0xcc   : > { %623 = vmatprep.subr.bf16.mxu0 %v1556_v36 }
  0xcd   : > { %933 = vmatpush1.bf16.msra.mxu1 %v1582_v33  ;;  %v2170_v36 = vshrl.u32 %v423_v35, 7 }
  0xcf   : > { %624 = vmatpush1.bf16.msra.mxu0 %v1558_v37  ;;  %v2447_v37 = vsub.s32 1, %v2170_v36  ;;  %v2448_v22 = vsub.s32 0, %v2170_v36 }
  0xd2   : > { %626 = vmatmul.mubr.bf16.vlgmr.msra.gmra.mrb[0].mxu0 %v373_v42  ;;  %v421_v42 = vld [vmem:[%s2438_s3] sm:$0x3] }
  0xd3   : > { %635 = vmatprep.mubr.bf16.mxu0 %v376_v43  ;;  %v2178_v43 = vrot.slane %v421_v42, %v2447_v37  ;;  %v2196_v28 = vrot.slane %v421_v42, %v2448_v22 }
  0xda   : > { %636 = vmatmul.mubr.bf16.gmra.mrb[4].mxu0 %v375_v48 }
  0xdb   : > { %645 = vmatprep.mubr.bf16.mxu0 %v378_v49 }
  0xe2   : > { %646 = vmatmul.mubr.bf16.gmra.mrb[8].mxu0 %v377_v54 }
  0xe3   : > { %655 = vmatprep.mubr.bf16.mxu0 %v380_v55 }
  0xea   : > { %656 = vmatmul.mubr.bf16.gmra.mrb[12].mxu0 %v379_v60 }
  0xeb   : > { %665 = vmatprep.mubr.bf16.mxu0 %v382_v61 }
  0xf2   : > { %666 = vmatmul.mubr.bf16.gmra.mrb[16].mxu0 %v381_v2 }
  0xf3   : > { %675 = vmatprep.mubr.bf16.mxu0 %v384_v3 }
  0xfa   : > { %676 = vmatmul.mubr.bf16.gmra.mrb[20].mxu0 %v383_v8 }
  0xfb   : > { %685 = vmatprep.mubr.bf16.mxu0 %v386_v9 }
 0x102   : > { %686 = vmatmul.mubr.bf16.gmra.mrb[24].mxu0 %v385_v16 }
 0x103   : > { %695 = vmatprep.mubr.bf16.mxu0 %v388_v17 }
 0x10a   : > { %696 = vmatmul.mubr.bf16.gmra.mrb[28].mxu0 %v387_v20 }
 0x1a5   : > { %v627_v48 = vpop.f32.mrb[0].mxu0 }
 0x1a6   : > { %v629_v49 = vpop.f32.mrb[1].mxu0 }
 0x1a7   : > { %v630_v54 = vadd.f32 %v629_v49, %v2178_v43  ;;  %v631_v55 = vpop.f32.mrb[2].mxu0 }
 0x1a8   : > { %v633_v60 = vpop.f32.mrb[3].mxu0 }
 0x1a9   : > { %v706_v61 = vmul.f32 0.5, %v630_v54  ;;  %v2182_v2 = vadd.f32 %v633_v60, %v2178_v43  ;;  %v755_v60 = vld [vmem:[%s2027_s18 + $0x8] sm:$0xff] }
 0x1ab   : > { %v722_v3 = vmul.f32 1.442695, %v706_v61  ;;  %v707_v8 = vmul.f32 0.5, %v2182_v2  ;;  %v628_v61 = vadd.f32 %v627_v48, %v2196_v28 }
 0x1ad   : > { %1583 = vpow2.f32 %v722_v3  ;;  %v724_v9 = vmul.f32 1.442695, %v707_v8  ;;  %v637_v16 = vpop.f32.mrb[4].mxu0 }
 0x1ae   : > { %v639_v17 = vpop.f32.mrb[5].mxu0 }
 0x1af   : > { %1585 = vpow2.f32 %v724_v9  ;;  %v2186_v20 = vadd.f32 %v639_v17, %v2178_v43  ;;  %v641_v21 = vpop.f32.mrb[6].mxu0 }
 0x1b0   : > { %v643_v23 = vpop.f32.mrb[7].mxu0 }
 0x1b1   : > { %v708_v24 = vmul.f32 0.5, %v2186_v20  ;;  %v2191_v25 = vadd.f32 %v643_v23, %v2178_v43  ;;  %v632_v23 = vadd.f32 %v631_v55, %v2196_v28 }
 0x1b3   : > { %v726_v26 = vmul.f32 1.442695, %v708_v24  ;;  %v709_v27 = vmul.f32 0.5, %v2191_v25 }
 0x1b5   : > { %1587 = vpow2.f32 %v726_v26  ;;  %v728_v29 = vmul.f32 1.442695, %v709_v27  ;;  %v2198_v30 = vpop.f32.mrb[8].mxu0 }
 0x1b6   : > { %v649_v32 = vpop.f32.mrb[9].mxu0 }
 0x1b7   : > { %v1584_v33 = vpop.eup %1583  ;;  %1589 = vpow2.f32 %v728_v29  ;;  %v2202_v35 = vadd.f32 %v649_v32, %v2178_v43  ;;  %v2204_v49 = vpop.f32.mrb[10].mxu0 }
 0x1b8   : > { %v653_v3 = vpop.f32.mrb[11].mxu0  ;;  %v770_v42 = vmul.f32 %v1584_v33, %v754_v31  ;;  %v756_v31 = vld [vmem:[%s2027_s18 + $0x10] sm:$0xff] }
 0x1b9   : > { %v1586_v8 = vpop.eup %1585  ;;  %v710_v9 = vmul.f32 0.5, %v2202_v35  ;;  %v2210_v17 = vadd.f32 %v653_v3, %v2178_v43 }
 0x1ba   : > { %v786_v24 = vadd.f32 %v770_v42, %v628_v61  ;;  %v771_v26 = vmul.f32 %v1586_v8, %v755_v60  ;;  %v757_v61 = vld [vmem:[%s2027_s18 + $0x18] sm:$0xff]  ;;  %v638_v42 = vadd.f32 %v637_v16, %v2196_v28 }
 0x1bb   : > { %v730_v27 = vmul.f32 1.442695, %v710_v9  ;;  %v711_v29 = vmul.f32 0.5, %v2210_v17 }
 0x1bc   : > { %v1143_v32 = vmul.f32 %v786_v24, %v786_v24  ;;  %v787_v37 = vadd.f32 %v771_v26, %v632_v23  ;;  %v2473_v26 = vmov 0  }
 0x1bd   : > { %1591 = vpow2.f32 %v730_v27  ;;  %v732_v48 = vmul.f32 1.442695, %v711_v29  ;;  %v2214_v22 = vpop.f32.mrb[12].mxu0  ;;  %v642_v27 = vadd.f32 %v641_v21, %v2196_v28 }
 0x1be   : > { %v659_v33 = vpop.f32.mrb[13].mxu0  ;;  %v1159_v34 = vsub.f32 %v1143_v32, %v630_v54  ;;  %v802_v15 = vpack.c.bf16 %v787_v37, %v786_v24  ;;  %v1144_v3 = vmul.f32 %v787_v37, %v787_v37 }
 0x1bf   : > { %v1588_v19 = vpop.eup %1587  ;;  %1593 = vpow2.f32 %v732_v48  ;;  %v2218_v55 = vadd.f32 %v659_v33, %v2178_v43  ;;  %v2220_v60 = vpop.f32.mrb[14].mxu0 }
 0x1c0   : > { %v663_v8 = vpop.f32.mrb[15].mxu0  ;;  %1175 = vadd.xlane.f32.xlu1 %v1159_v34  ;;  %951 = vmatmul.mubr.bf16.vlgmr.msra.gmra.mrb[0].mxu1 %v802_v15  ;;  %v1160_v9 = vsub.f32 %v1144_v3, %v2182_v2  ;;  %v772_v23 = vmul.f32 %v1588_v19, %v756_v31  ;;  %v758_v31 = vld [vmem:[%s2027_s18 + $0x20] sm:$0xff] }
 0x1c1   : > { %v1590_v54 = vpop.eup %1589  ;;  %v712_v37 = vmul.f32 0.5, %v2218_v55  ;;  %v2227_v24 = vadd.f32 %v663_v8, %v2178_v43  ;;  %960 = vmatprep.mubr.bf16.mxu1 %v2473_v26 }
 0x1c2   : > { %v788_v29 = vadd.f32 %v772_v23, %v638_v42  ;;  %v773_v32 = vmul.f32 %v1590_v54, %v757_v61  ;;  %v648_v23 = vadd.f32 %v2198_v30, %v2196_v28 }
 0x1c3   : > { %v734_v16 = vmul.f32 1.442695, %v712_v37  ;;  %v713_v34 = vmul.f32 0.5, %v2227_v24 }
 0x1c4   : > { %1177 = vadd.xlane.f32.xlu1 %v1160_v9  ;;  %v1145_v15 = vmul.f32 %v788_v29, %v788_v29  ;;  %v789_v19 = vadd.f32 %v773_v32, %v642_v27  ;;  %v759_v9 = vld [vmem:[%s2027_s18 + $0x28] sm:$0xff] }
 0x1c5   : > { %1595 = vpow2.f32 %v734_v16  ;;  %v736_v2 = vmul.f32 1.442695, %v713_v34  ;;  %v2232_v48 = vpop.f32.mrb[16].mxu0  ;;  %v652_v16 = vadd.f32 %v2204_v49, %v2196_v28 }
 0x1c6   : > { %v669_v33 = vpop.f32.mrb[17].mxu0  ;;  %v1161_v3 = vsub.f32 %v1145_v15, %v2186_v20  ;;  %v803_v8 = vpack.c.bf16 %v789_v19, %v788_v29  ;;  %v1146_v12 = vmul.f32 %v789_v19, %v789_v19 }
 0x1c7   : > { %v1592_v21 = vpop.eup %1591  ;;  %1597 = vpow2.f32 %v736_v2  ;;  %v2237_v61 = vadd.f32 %v669_v33, %v2178_v43  ;;  %v2239_v42 = vpop.f32.mrb[18].mxu0  ;;  %v760_v33 = vld [vmem:[%s2027_s18 + $0x30] sm:$0xff] }
 0x1c8   : > { %v673_v54 = vpop.f32.mrb[19].mxu0  ;;  %1179 = vadd.xlane.f32.xlu1 %v1161_v3  ;;  %961 = vmatmul.mubr.bf16.gmra.mrb[4].mxu1 %v803_v8  ;;  %v1162_v37 = vsub.f32 %v1146_v12, %v2191_v25  ;;  %v774_v27 = vmul.f32 %v1592_v21, %v758_v31 }
 0x1c9   : > { %v1594_v20 = vpop.eup %1593  ;;  %v714_v29 = vmul.f32 0.5, %v2237_v61  ;;  %v2247_v32 = vadd.f32 %v673_v54, %v2178_v43  ;;  %970 = vmatprep.mubr.bf16.mxu1 %v2473_v26 }
 0x1ca   : > { %v790_v34 = vadd.f32 %v774_v27, %v648_v23  ;;  %v775_v30 = vmul.f32 %v1594_v20, %v759_v9  ;;  %v658_v27 = vadd.f32 %v2214_v22, %v2196_v28 }
 0x1cb   : > { %v738_v15 = vmul.f32 1.442695, %v714_v29  ;;  %v715_v19 = vmul.f32 0.5, %v2247_v32 }
 0x1cc   : > { %1181 = vadd.xlane.f32.xlu1 %v1162_v37  ;;  %v1147_v12 = vmul.f32 %v790_v34, %v790_v34  ;;  %v791_v25 = vadd.f32 %v775_v30, %v652_v16  ;;  %v761_v37 = vld [vmem:[%s2027_s18 + $0x38] sm:$0xff] }
 0x1cd   : > { %1599 = vpow2.f32 %v738_v15  ;;  %v740_v2 = vmul.f32 1.442695, %v715_v19  ;;  %v2253_v31 = vpop.f32.mrb[20].mxu0  ;;  %v662_v15 = vadd.f32 %v2220_v60, %v2196_v28 }
 0x1ce   : > { %v679_v3 = vpop.f32.mrb[21].mxu0  ;;  %v1163_v8 = vsub.f32 %v1147_v12, %v2202_v35  ;;  %v804_v21 = vpack.c.bf16 %v791_v25, %v790_v34  ;;  %v1148_v54 = vmul.f32 %v791_v25, %v791_v25 }
 0x1cf   : > { %v1596_v49 = vpop.eup %1595  ;;  %1601 = vpow2.f32 %v740_v2  ;;  %v2258_v9 = vadd.f32 %v679_v3, %v2178_v43  ;;  %v2260_v23 = vpop.f32.mrb[22].mxu0 }
 0x1d0   : > { %v683_v20 = vpop.f32.mrb[23].mxu0  ;;  %1183 = vadd.xlane.f32.xlu1 %v1163_v8  ;;  %971 = vmatmul.mubr.bf16.gmra.mrb[8].mxu1 %v804_v21  ;;  %v1164_v29 = vsub.f32 %v1148_v54, %v2210_v17  ;;  %v776_v16 = vmul.f32 %v1596_v49, %v760_v33  ;;  %v762_v8 = vld [vmem:[%s2027_s18 + $0x40] sm:$0xff] }
 0x1d1   : > { %v1598_v35 = vpop.eup %1597  ;;  %v716_v34 = vmul.f32 0.5, %v2258_v9  ;;  %v2268_v30 = vadd.f32 %v683_v20, %v2178_v43  ;;  %980 = vmatprep.mubr.bf16.mxu1 %v2473_v26 }
 0x1d2   : > { %v792_v19 = vadd.f32 %v776_v16, %v658_v27  ;;  %v777_v22 = vmul.f32 %v1598_v35, %v761_v37  ;;  %v668_v16 = vadd.f32 %v2232_v48, %v2196_v28 }
 0x1d3   : > { %v742_v12 = vmul.f32 1.442695, %v716_v34  ;;  %v717_v25 = vmul.f32 0.5, %v2268_v30 }
 0x1d4   : > { %1185 = vadd.xlane.f32.xlu1 %v1164_v29  ;;  %v1149_v17 = vmul.f32 %v792_v19, %v792_v19  ;;  %v793_v2 = vadd.f32 %v777_v22, %v662_v15  ;;  %v763_v29 = vld [vmem:[%s2027_s18 + $0x48] sm:$0xff] }
 0x1d5   : > { %1603 = vpow2.f32 %v742_v12  ;;  %v744_v33 = vmul.f32 1.442695, %v717_v25  ;;  %v2274_v3 = vpop.f32.mrb[24].mxu0  ;;  %v672_v12 = vadd.f32 %v2239_v42, %v2196_v28 }
 0x1d6   : > { %v689_v21 = vpop.f32.mrb[25].mxu0  ;;  %v1165_v54 = vsub.f32 %v1149_v17, %v2218_v55  ;;  %v805_v49 = vpack.c.bf16 %v793_v2, %v792_v19  ;;  %v1150_v20 = vmul.f32 %v793_v2, %v793_v2 }
 0x1d7   : > { %v1600_v60 = vpop.eup %1599  ;;  %1605 = vpow2.f32 %v744_v33  ;;  %v2279_v37 = vadd.f32 %v689_v21, %v2178_v43  ;;  %v2281_v27 = vpop.f32.mrb[26].mxu0 }
 0x1d8   : > { %v693_v35 = vpop.f32.mrb[27].mxu0  ;;  %1187 = vadd.xlane.f32.xlu1 %v1165_v54  ;;  %981 = vmatmul.mubr.bf16.gmra.mrb[12].mxu1 %v805_v49  ;;  %v1166_v34 = vsub.f32 %v1150_v20, %v2227_v24  ;;  %v778_v15 = vmul.f32 %v1600_v60, %v762_v8  ;;  %v764_v54 = vld [vmem:[%s2027_s18 + $0x50] sm:$0xff] }
 0x1d9   : > { %v1602_v55 = vpop.eup %1601  ;;  %v718_v19 = vmul.f32 0.5, %v2279_v37  ;;  %v2289_v22 = vadd.f32 %v693_v35, %v2178_v43  ;;  %990 = vmatprep.mubr.bf16.mxu1 %v2473_v26 }
 0x1da   : > { %v794_v25 = vadd.f32 %v778_v15, %v668_v16  ;;  %v779_v48 = vmul.f32 %v1602_v55, %v763_v29  ;;  %v765_v16 = vld [vmem:[%s2027_s18 + $0x58] sm:$0xff] }
 0x1db   : > { %v746_v17 = vmul.f32 1.442695, %v718_v19  ;;  %v719_v2 = vmul.f32 0.5, %v2289_v22 }
 0x1dc   : > { %1189 = vadd.xlane.f32.xlu1 %v1166_v34  ;;  %v1151_v24 = vmul.f32 %v794_v25, %v794_v25  ;;  %v795_v33 = vadd.f32 %v779_v48, %v672_v12  ;;  %v678_v34 = vadd.f32 %v2253_v31, %v2196_v28  ;;  %v682_v48 = vadd.f32 %v2260_v23, %v2196_v28 }
 0x1dd   : > { %1607 = vpow2.f32 %v746_v17  ;;  %v748_v8 = vmul.f32 1.442695, %v719_v2  ;;  %v697_v21 = vpop.f32.mrb[28].mxu0  ;;  %v688_v23 = vadd.f32 %v2274_v3, %v2196_v28 }
 0x1de   : > { %v699_v49 = vpop.f32.mrb[29].mxu0  ;;  %v1167_v20 = vsub.f32 %v1151_v24, %v2237_v61  ;;  %v806_v60 = vpack.c.bf16 %v795_v33, %v794_v25  ;;  %v1152_v35 = vmul.f32 %v795_v33, %v795_v33 }
 0x1df   : > { %v1604_v18 = vpop.eup %1603  ;;  %1609 = vpow2.f32 %v748_v8  ;;  %v2298_v42 = vadd.f32 %v699_v49, %v2178_v43  ;;  %v701_v29 = vpop.f32.mrb[30].mxu0  ;;  %v766_v8 = vld [vmem:[%s2027_s18 + $0x60] sm:$0xff] }
 0x1e0   : > { %v703_v15 = vpop.f32.mrb[31].mxu0  ;;  %1191 = vadd.xlane.f32.xlu1 %v1167_v20  ;;  %991 = vmatmul.mubr.bf16.gmra.mrb[16].mxu1 %v806_v60  ;;  %v1168_v55 = vsub.f32 %v1152_v35, %v2247_v32  ;;  %v780_v19 = vmul.f32 %v1604_v18, %v764_v54  ;;  %v767_v60 = vld [vmem:[%s2027_s18 + $0x68] sm:$0xff] }
 0x1e1   : > { %v1606_v61 = vpop.eup %1605  ;;  %v720_v12 = vmul.f32 0.5, %v2298_v42  ;;  %v704_v25 = vadd.f32 %v703_v15, %v2178_v43  ;;  %1000 = vmatprep.mubr.bf16.mxu1 %v2473_v26 }
 0x1e2   : > { %v796_v17 = vadd.f32 %v780_v19, %v678_v34  ;;  %v781_v31 = vmul.f32 %v1606_v61, %v765_v16 }
 0x1e3   : > { %v750_v2 = vmul.f32 1.442695, %v720_v12  ;;  %v721_v24 = vmul.f32 0.5, %v704_v25  ;;  %v768_v12 = vld [vmem:[%s2027_s18 + $0x70] sm:$0xff] }
 0x1e4   : > { %1193 = vadd.xlane.f32.xlu1 %v1168_v55  ;;  %v1153_v33 = vmul.f32 %v796_v17, %v796_v17  ;;  %v797_v32 = vadd.f32 %v781_v31, %v682_v48 }
 0x1e5   : > { %1611 = vpow2.f32 %v750_v2  ;;  %v752_v18 = vmul.f32 1.442695, %v721_v24  ;;  %v769_v2 = vld [vmem:[%s2027_s18 + $0x78] sm:$0xff] }
 0x1e6   : > { %v1169_v54 = vsub.f32 %v1153_v33, %v2258_v9  ;;  %v807_v49 = vpack.c.bf16 %v797_v32, %v796_v17  ;;  %v1154_v43 = vmul.f32 %v797_v32, %v797_v32  ;;  %v692_v9 = vadd.f32 %v2281_v27, %v2196_v28 }
 0x1e7   : > { %v1608_v20 = vpop.eup %1607  ;;  %1613 = vpow2.f32 %v752_v18  ;;  %v702_v32 = vadd.f32 %v701_v29, %v2196_v28  ;;  %v2475_v29 = vsub.s32 1, %v2170_v36 }
 0x1e8   : > { %1195 = vadd.xlane.f32.xlu1 %v1169_v54  ;;  %1001 = vmatmul.mubr.bf16.gmra.mrb[20].mxu1 %v807_v49  ;;  %v1170_v35 = vsub.f32 %v1154_v43, %v2268_v30  ;;  %v782_v16 = vmul.f32 %v1608_v20, %v766_v8  ;;  %v698_v30 = vadd.f32 %v697_v21, %v2196_v28 }
 0x1e9   : > { %v1610_v34 = vpop.eup %1609  ;;  %1010 = vmatprep.mubr.bf16.mxu1 %v2473_v26 }
 0x1ea   : > { %v798_v15 = vadd.f32 %v782_v16, %v688_v23  ;;  %v783_v55 = vmul.f32 %v1610_v34, %v767_v60 }
 0x1ec   : > { %1197 = vadd.xlane.f32.xlu1 %v1170_v35  ;;  %v1155_v19 = vmul.f32 %v798_v15, %v798_v15  ;;  %v799_v61 = vadd.f32 %v783_v55, %v692_v9 }
 0x1ee   : > { %v1171_v3 = vsub.f32 %v1155_v19, %v2279_v37  ;;  %v808_v48 = vpack.c.bf16 %v799_v61, %v798_v15  ;;  %v1156_v17 = vmul.f32 %v799_v61, %v799_v61 }
 0x1ef   : > { %v1612_v31 = vpop.eup %1611 }
 0x1f0   : > { %1199 = vadd.xlane.f32.xlu1 %v1171_v3  ;;  %1011 = vmatmul.mubr.bf16.gmra.mrb[24].mxu1 %v808_v48  ;;  %v1172_v24 = vsub.f32 %v1156_v17, %v2289_v22  ;;  %v784_v33 = vmul.f32 %v1612_v31, %v768_v12  ;;  %v826_v22 = vld [vmem:[%s2440_s5] sm:$0x3] }
 0x1f1   : > { %v1614_v27 = vpop.eup %1613  ;;  %1020 = vmatprep.mubr.bf16.mxu1 %v2473_v26  ;;  %v2474_v26 = vsub.s32 0, %v2170_v36  ;;  %v2335_v60 = vrot.slane %v826_v22, %v2475_v29 }
 0x1f2   : > { %v800_v18 = vadd.f32 %v784_v33, %v698_v30  ;;  %v785_v8 = vmul.f32 %v1614_v27, %v769_v2 }
 0x1f3   : > { %v2331_v28 = vrot.slane %v826_v22, %v2474_v26 }
 0x1f4   : > { %1201 = vadd.xlane.f32.xlu1 %v1172_v24  ;;  %v1157_v37 = vmul.f32 %v800_v18, %v800_v18  ;;  %v801_v54 = vadd.f32 %v785_v8, %v702_v32 }
 0x1f6   : > { %v1173_v49 = vsub.f32 %v1157_v37, %v2298_v42  ;;  %v809_v43 = vpack.c.bf16 %v801_v54, %v800_v18  ;;  %v1158_v20 = vmul.f32 %v801_v54, %v801_v54 }
 0x1f8   : > { %1203 = vadd.xlane.f32.xlu1 %v1173_v49  ;;  %1021 = vmatmul.mubr.bf16.gmra.mrb[28].mxu1 %v809_v43  ;;  %v1174_v21 = vsub.f32 %v1158_v20, %v704_v25 }
 0x1fc   : > { %1205 = vadd.xlane.f32.xlu1 %v1174_v21 }
 0x293   : > { %v952_v23 = vpop.f32.mrb[0].mxu1 }
 0x294   : > { %v953_v42 = vadd.f32 %v952_v23, %v2331_v28  ;;  %v954_v35 = vpop.f32.mrb[1].mxu1 }
 0x295   : > { %v955_v16 = vadd.f32 %v954_v35, %v2335_v60  ;;  %v956_v25 = vpop.f32.mrb[2].mxu1 }
 0x296   : > { %v957_v34 = vadd.f32 %v956_v25, %v2331_v28  ;;  %v958_v9 = vpop.f32.mrb[3].mxu1  ;;  %v1031_v15 = vsub.f32 %v2050_v38, %v953_v42 }
 0x297   : > { %v959_v55 = vadd.f32 %v958_v9, %v2335_v60  ;;  %v1032_v19 = vsub.f32 %v2042_v13, %v955_v16 }
 0x298   : > { %v1033_v36 = vsub.f32 %v2053_v39, %v957_v34  ;;  %v1063_v61 = vmul.f32 %v1031_v15, %v1031_v15 }
 0x299   : > { %v1034_v12 = vsub.f32 %v2045_v14, %v959_v55  ;;  %v1064_v3 = vmul.f32 %v1032_v19, %v1032_v19 }
 0x29a   : > { %v1065_v48 = vmul.f32 %v1033_v36, %v1033_v36 }
 0x29b   : > { %v1066_v17 = vmul.f32 %v1034_v12, %v1034_v12  ;;  %v962_v31 = vpop.f32.mrb[4].mxu1  ;;  %v1095_v2 = vadd.f32 %v1064_v3, %v1063_v61 }
 0x29c   : > { %v963_v30 = vadd.f32 %v962_v31, %v2331_v28  ;;  %v964_v24 = vpop.f32.mrb[5].mxu1 }
 0x29d   : > { %v965_v33 = vadd.f32 %v964_v24, %v2335_v60  ;;  %v966_v38 = vpop.f32.mrb[6].mxu1  ;;  %1096 = vadd.xlane.f32.xlu0 %v1095_v2  ;;  %v1098_v27 = vadd.f32 %v1066_v17, %v1065_v48 }
 0x29e   : > { %v1035_v13 = vsub.f32 %v2066_v44, %v963_v30  ;;  %v967_v39 = vadd.f32 %v966_v38, %v2331_v28  ;;  %v968_v32 = vpop.f32.mrb[7].mxu1 }
 0x29f   : > { %v1036_v14 = vsub.f32 %v2056_v40, %v965_v33  ;;  %v969_v18 = vadd.f32 %v968_v32, %v2335_v60 }
 0x2a0   : > { %v1067_v8 = vmul.f32 %v1035_v13, %v1035_v13  ;;  %v1037_v37 = vsub.f32 %v2069_v45, %v967_v39 }
 0x2a1   : > { %v1068_v54 = vmul.f32 %v1036_v14, %v1036_v14  ;;  %v1038_v49 = vsub.f32 %v2059_v41, %v969_v18  ;;  %1099 = vadd.xlane.f32.xlu0 %v1098_v27 }
 0x2a2   : > { %v1069_v43 = vmul.f32 %v1037_v37, %v1037_v37 }
 0x2a3   : > { %v1070_v20 = vmul.f32 %v1038_v49, %v1038_v49  ;;  %v972_v21 = vpop.f32.mrb[8].mxu1  ;;  %v1101_v22 = vadd.f32 %v1068_v54, %v1067_v8 }
 0x2a4   : > { %v973_v44 = vadd.f32 %v972_v21, %v2331_v28  ;;  %v974_v26 = vpop.f32.mrb[9].mxu1 }
 0x2a5   : > { %v975_v29 = vadd.f32 %v974_v26, %v2335_v60  ;;  %v976_v23 = vpop.f32.mrb[10].mxu1  ;;  %1102 = vadd.xlane.f32.xlu0 %v1101_v22  ;;  %v1104_v40 = vadd.f32 %v1070_v20, %v1069_v43 }
 0x2a6   : > { %v1039_v42 = vsub.f32 %v2082_v50, %v973_v44  ;;  %v977_v45 = vadd.f32 %v976_v23, %v2331_v28  ;;  %v978_v35 = vpop.f32.mrb[11].mxu1 }
 0x2a7   : > { %v1040_v41 = vsub.f32 %v2072_v46, %v975_v29  ;;  %v979_v16 = vadd.f32 %v978_v35, %v2335_v60 }
 0x2a8   : > { %v1071_v25 = vmul.f32 %v1039_v42, %v1039_v42  ;;  %v1041_v34 = vsub.f32 %v2085_v51, %v977_v45 }
 0x2a9   : > { %v1072_v9 = vmul.f32 %v1040_v41, %v1040_v41  ;;  %v1042_v15 = vsub.f32 %v2075_v47, %v979_v16  ;;  %1105 = vadd.xlane.f32.xlu0 %v1104_v40 }
 0x2aa   : > { %v1073_v55 = vmul.f32 %v1041_v34, %v1041_v34 }
 0x2ab   : > { %v1074_v19 = vmul.f32 %v1042_v15, %v1042_v15  ;;  %v982_v36 = vpop.f32.mrb[12].mxu1  ;;  %v1107_v61 = vadd.f32 %v1072_v9, %v1071_v25 }
 0x2ac   : > { %v983_v50 = vadd.f32 %v982_v36, %v2331_v28  ;;  %v984_v12 = vpop.f32.mrb[13].mxu1 }
 0x2ad   : > { %v985_v3 = vadd.f32 %v984_v12, %v2335_v60  ;;  %v986_v48 = vpop.f32.mrb[14].mxu1  ;;  %1108 = vadd.xlane.f32.xlu0 %v1107_v61  ;;  %v1110_v46 = vadd.f32 %v1074_v19, %v1073_v55 }
 0x2ae   : > { %v1043_v17 = vsub.f32 %v2098_v56, %v983_v50  ;;  %v987_v51 = vadd.f32 %v986_v48, %v2331_v28  ;;  %v988_v31 = vpop.f32.mrb[15].mxu1 }
 0x2af   : > { %v1044_v47 = vsub.f32 %v2088_v52, %v985_v3  ;;  %v989_v2 = vadd.f32 %v988_v31, %v2335_v60 }
 0x2b0   : > { %v1075_v30 = vmul.f32 %v1043_v17, %v1043_v17  ;;  %v1045_v24 = vsub.f32 %v2101_v57, %v987_v51 }
 0x2b1   : > { %v1076_v33 = vmul.f32 %v1044_v47, %v1044_v47  ;;  %v1046_v38 = vsub.f32 %v2091_v53, %v989_v2  ;;  %1111 = vadd.xlane.f32.xlu0 %v1110_v46 }
 0x2b2   : > { %v1077_v27 = vmul.f32 %v1045_v24, %v1045_v24 }
 0x2b3   : > { %v1078_v13 = vmul.f32 %v1046_v38, %v1046_v38  ;;  %v992_v39 = vpop.f32.mrb[16].mxu1  ;;  %v1113_v32 = vadd.f32 %v1076_v33, %v1075_v30 }
 0x2b4   : > { %v993_v56 = vadd.f32 %v992_v39, %v2331_v28  ;;  %v994_v14 = vpop.f32.mrb[17].mxu1 }
 0x2b5   : > { %v995_v18 = vadd.f32 %v994_v14, %v2335_v60  ;;  %v996_v8 = vpop.f32.mrb[18].mxu1  ;;  %1114 = vadd.xlane.f32.xlu0 %v1113_v32  ;;  %v1116_v52 = vadd.f32 %v1078_v13, %v1077_v27  ;;  %v2476_v32 = vld [vmem:[#allocation15_spill] sm:$0xff] }
 0x2b6   : > { %v1047_v37 = vsub.f32 %v2114_v62, %v993_v56  ;;  %v997_v57 = vadd.f32 %v996_v8, %v2331_v28  ;;  %v998_v54 = vpop.f32.mrb[19].mxu1 }
 0x2b7   : > { %v1048_v53 = vsub.f32 %v2104_v58, %v995_v18  ;;  %v999_v49 = vadd.f32 %v998_v54, %v2335_v60  ;;  %v2477_v18 = vld [vmem:[#allocation13_spill] sm:$0xff] }
 0x2b8   : > { %v1079_v43 = vmul.f32 %v1047_v37, %v1047_v37  ;;  %v1049_v20 = vsub.f32 %v2117_v63, %v997_v57  ;;  %v2478_v37 = vld [vmem:[#allocation16_spill] sm:$0xff] }
 0x2b9   : > { %v1080_v21 = vmul.f32 %v1048_v53, %v1048_v53  ;;  %v1050_v22 = vsub.f32 %v2107_v59, %v999_v49  ;;  %1117 = vadd.xlane.f32.xlu0 %v1116_v52  ;;  %v2479_v53 = vld [vmem:[#allocation14_spill] sm:$0xff] }
 0x2ba   : > { %v1081_v44 = vmul.f32 %v1049_v20, %v1049_v20 }
 0x2bb   : > { %v1082_v26 = vmul.f32 %v1050_v22, %v1050_v22  ;;  %v1002_v29 = vpop.f32.mrb[20].mxu1  ;;  %v1119_v23 = vadd.f32 %v1080_v21, %v1079_v43 }
 0x2bc   : > { %v1003_v62 = vadd.f32 %v1002_v29, %v2331_v28  ;;  %v1004_v40 = vpop.f32.mrb[21].mxu1 }
 0x2bd   : > { %v1005_v42 = vadd.f32 %v1004_v40, %v2335_v60  ;;  %v1006_v45 = vpop.f32.mrb[22].mxu1  ;;  %1120 = vadd.xlane.f32.xlu0 %v1119_v23  ;;  %v1122_v58 = vadd.f32 %v1082_v26, %v1081_v44  ;;  %v1176_v44 = vpop.xlane.xlu1 %1175 }
 0x2be   : > { %v1051_v35 = vsub.f32 %v2130_v4, %v1003_v62  ;;  %v1007_v63 = vadd.f32 %v1006_v45, %v2331_v28  ;;  %v1008_v41 = vpop.f32.mrb[23].mxu1 }
 0x2bf   : > { %v1052_v59 = vsub.f32 %v2120_v0, %v1005_v42  ;;  %v1009_v16 = vadd.f32 %v1008_v41, %v2335_v60 }
 0x2c0   : > { %v1083_v25 = vmul.f32 %v1051_v35, %v1051_v35  ;;  %v1053_v34 = vsub.f32 %v2133_v5, %v1007_v63 }
 0x2c1   : > { %v1084_v9 = vmul.f32 %v1052_v59, %v1052_v59  ;;  %v1054_v15 = vsub.f32 %v2123_v1, %v1009_v16  ;;  %1123 = vadd.xlane.f32.xlu0 %v1122_v58 }
 0x2c2   : > { %v1085_v55 = vmul.f32 %v1053_v34, %v1053_v34 }
 0x2c3   : > { %v1086_v19 = vmul.f32 %v1054_v15, %v1054_v15  ;;  %v1012_v36 = vpop.f32.mrb[24].mxu1  ;;  %v1125_v61 = vadd.f32 %v1084_v9, %v1083_v25 }
 0x2c4   : > { %v1013_v4 = vadd.f32 %v1012_v36, %v2331_v28  ;;  %v1014_v50 = vpop.f32.mrb[25].mxu1 }
 0x2c5   : > { %v1015_v12 = vadd.f32 %v1014_v50, %v2335_v60  ;;  %v1016_v3 = vpop.f32.mrb[26].mxu1  ;;  %1126 = vadd.xlane.f32.xlu0 %v1125_v61  ;;  %v1128_v0 = vadd.f32 %v1086_v19, %v1085_v55 }
 0x2c6   : > { %v1055_v48 = vsub.f32 %v2146_v10, %v1013_v4  ;;  %v1017_v5 = vadd.f32 %v1016_v3, %v2331_v28  ;;  %v1018_v46 = vpop.f32.mrb[27].mxu1 }
 0x2c7   : > { %v1056_v1 = vsub.f32 %v2136_v6, %v1015_v12  ;;  %v1019_v17 = vadd.f32 %v1018_v46, %v2335_v60 }
 0x2c8   : > { %v1087_v51 = vmul.f32 %v1055_v48, %v1055_v48  ;;  %v1057_v31 = vsub.f32 %v2149_v11, %v1017_v5 }
 0x2c9   : > { %v1088_v47 = vmul.f32 %v1056_v1, %v1056_v1  ;;  %v1058_v2 = vsub.f32 %v2139_v7, %v1019_v17  ;;  %1129 = vadd.xlane.f32.xlu0 %v1128_v0 }
 0x2ca   : > { %v1089_v30 = vmul.f32 %v1057_v31, %v1057_v31 }
 0x2cb   : > { %v1090_v24 = vmul.f32 %v1058_v2, %v1058_v2  ;;  %v1022_v33 = vpop.f32.mrb[28].mxu1  ;;  %v1131_v38 = vadd.f32 %v1088_v47, %v1087_v51 }
 0x2cc   : > { %v1023_v10 = vadd.f32 %v1022_v33, %v2331_v28  ;;  %v1024_v27 = vpop.f32.mrb[29].mxu1 }
 0x2cd   : > { %v1025_v13 = vadd.f32 %v1024_v27, %v2335_v60  ;;  %v1026_v39 = vpop.f32.mrb[30].mxu1  ;;  %1132 = vadd.xlane.f32.xlu0 %v1131_v38  ;;  %v1134_v6 = vadd.f32 %v1090_v24, %v1089_v30 }
 0x2ce   : > { %v1059_v56 = vsub.f32 %v2476_v32, %v1023_v10  ;;  %v1027_v11 = vadd.f32 %v1026_v39, %v2331_v28  ;;  %v1028_v14 = vpop.f32.mrb[31].mxu1  ;;  %v1178_v28 = vpop.xlane.xlu1 %1177 }
 0x2cf   : > { %v1060_v7 = vsub.f32 %v2477_v18, %v1025_v13  ;;  %v1029_v8 = vadd.f32 %v1028_v14, %v2335_v60 }
 0x2d0   : > { %v1091_v52 = vmul.f32 %v1059_v56, %v1059_v56  ;;  %v1061_v57 = vsub.f32 %v2478_v37, %v1027_v11 }
 0x2d1   : > { %v1092_v54 = vmul.f32 %v1060_v7, %v1060_v7  ;;  %v1062_v49 = vsub.f32 %v2479_v53, %v1029_v8  ;;  %1135 = vadd.xlane.f32.xlu0 %v1134_v6 }
 0x2d2   : > { %v1093_v43 = vmul.f32 %v1061_v57, %v1061_v57  ;;  %v1180_v26 = vpop.xlane.xlu1 %1179 }
 0x2d3   : > { %v1094_v20 = vmul.f32 %v1062_v49, %v1062_v49  ;;  %v1137_v21 = vadd.f32 %v1092_v54, %v1091_v52 }
 0x2d5   : > { %1138 = vadd.xlane.f32.xlu0 %v1137_v21  ;;  %v1140_v22 = vadd.f32 %v1094_v20, %v1093_v43 }
 0x2d6   : > { %v1182_v29 = vpop.xlane.xlu1 %1181 }
 0x2d9   : > { %1141 = vadd.xlane.f32.xlu0 %v1140_v22 }
 0x2da   : > { %v1184_v23 = vpop.xlane.xlu1 %1183 }
 0x2de   : > { %v1186_v62 = vpop.xlane.xlu1 %1185 }
 0x2e2   : > { %v1188_v42 = vpop.xlane.xlu1 %1187 }
 0x2e6   : > { %v1190_v58 = vpop.xlane.xlu1 %1189 }
 0x2ea   : > { %v1192_v41 = vpop.xlane.xlu1 %1191 }
 0x2ee   : > { %v1194_v16 = vpop.xlane.xlu1 %1193 }
 0x2f2   : > { %v1196_v15 = vpop.xlane.xlu1 %1195 }
 0x2f6   : > { %v1198_v0 = vpop.xlane.xlu1 %1197 }
 0x2fa   : > { %v1200_v33 = vpop.xlane.xlu1 %1199 }
 0x2fe   : > { %v1202_v18 = vpop.xlane.xlu1 %1201 }
 0x302   : > { %v1204_v22 = vpop.xlane.xlu1 %1203 }
 0x32a   : > { %v1097_v60 = vpop.xlane.xlu0 %1096 }
 0x32b   : > { %v1207_v55 = vadd.f32 %v1176_v44, %v1097_v60 }
 0x32d   : > { %v1224_v50 = vsel %vm1223_vm0, %v1207_v55, 0.0 }
 0x32e   : > { %v1100_v40 = vpop.xlane.xlu0 %1099 }
 0x32f   : > { %v1208_v9 = vadd.f32 %v1178_v28, %v1100_v40 }
 0x331   : > { %v1225_v61 = vsel %vm1223_vm0, %v1208_v9, 0.0 }
 0x332   : > { %v1103_v45 = vpop.xlane.xlu0 %1102  ;;  %v1226_v48 = vadd.f32 %v1225_v61, %v1224_v50 }
 0x333   : > { %v1209_v19 = vadd.f32 %v1180_v26, %v1103_v45 }
 0x335   : > { %v1227_v12 = vsel %vm1223_vm0, %v1209_v19, 0.0 }
 0x336   : > { %v1106_v35 = vpop.xlane.xlu0 %1105  ;;  %v1228_v17 = vadd.f32 %v1227_v12, %v1226_v48 }
 0x337   : > { %v1210_v4 = vadd.f32 %v1182_v29, %v1106_v35 }
 0x339   : > { %v1229_v46 = vsel %vm1223_vm0, %v1210_v4, 0.0 }
 0x33a   : > { %v1109_v63 = vpop.xlane.xlu0 %1108  ;;  %v1230_v47 = vadd.f32 %v1229_v46, %v1228_v17 }
 0x33b   : > { %v1211_v3 = vadd.f32 %v1184_v23, %v1109_v63 }
 0x33d   : > { %v1231_v51 = vsel %vm1223_vm0, %v1211_v3, 0.0 }
 0x33e   : > { %v1112_v59 = vpop.xlane.xlu0 %1111  ;;  %v1232_v38 = vadd.f32 %v1231_v51, %v1230_v47 }
 0x33f   : > { %v1212_v1 = vadd.f32 %v1186_v62, %v1112_v59 }
 0x341   : > { %v1233_v30 = vsel %vm1223_vm0, %v1212_v1, 0.0 }
 0x342   : > { %v1115_v25 = vpop.xlane.xlu0 %1114  ;;  %v1234_v13 = vadd.f32 %v1233_v30, %v1232_v38 }
 0x343   : > { %v1213_v31 = vadd.f32 %v1188_v42, %v1115_v25  ;;  %v1206_v42 = vpop.xlane.xlu1 %1205 }
 0x345   : > { %v1235_v10 = vsel %vm1223_vm0, %v1213_v31, 0.0 }
 0x346   : > { %v1118_v34 = vpop.xlane.xlu0 %1117  ;;  %v1236_v56 = vadd.f32 %v1235_v10, %v1234_v13 }
 0x347   : > { %v1214_v24 = vadd.f32 %v1190_v58, %v1118_v34 }
 0x349   : > { %v1237_v6 = vsel %vm1223_vm0, %v1214_v24, 0.0 }
 0x34a   : > { %v1121_v36 = vpop.xlane.xlu0 %1120  ;;  %v1238_v7 = vadd.f32 %v1237_v6, %v1236_v56 }
 0x34b   : > { %v1215_v27 = vadd.f32 %v1192_v41, %v1121_v36 }
 0x34d   : > { %v1239_v11 = vsel %vm1223_vm0, %v1215_v27, 0.0 }
 0x34e   : > { %v1124_v5 = vpop.xlane.xlu0 %1123  ;;  %v1240_v57 = vadd.f32 %v1239_v11, %v1238_v7 }
 0x34f   : > { %v1216_v32 = vadd.f32 %v1194_v16, %v1124_v5 }
 0x351   : > { %v1241_v52 = vsel %vm1223_vm0, %v1216_v32, 0.0 }
 0x352   : > { %v1127_v2 = vpop.xlane.xlu0 %1126  ;;  %v1242_v49 = vadd.f32 %v1241_v52, %v1240_v57 }
 0x353   : > { %v1217_v14 = vadd.f32 %v1196_v15, %v1127_v2 }
 0x355   : > { %v1243_v54 = vsel %vm1223_vm0, %v1217_v14, 0.0 }
 0x356   : > { %v1130_v39 = vpop.xlane.xlu0 %1129  ;;  %v1244_v44 = vadd.f32 %v1243_v54, %v1242_v49 }
 0x357   : > { %v1218_v37 = vadd.f32 %v1198_v0, %v1130_v39 }
 0x359   : > { %v1245_v20 = vsel %vm1223_vm0, %v1218_v37, 0.0 }
 0x35a   : > { %v1133_v8 = vpop.xlane.xlu0 %1132  ;;  %v1246_v26 = vadd.f32 %v1245_v20, %v1244_v44 }
 0x35b   : > { %v1219_v53 = vadd.f32 %v1200_v33, %v1133_v8 }
 0x35d   : > { %v1247_v28 = vsel %vm1223_vm0, %v1219_v53, 0.0 }
 0x35e   : > { %v1136_v43 = vpop.xlane.xlu0 %1135  ;;  %v1248_v60 = vadd.f32 %v1247_v28, %v1246_v26 }
 0x35f   : > { %v1220_v21 = vadd.f32 %v1202_v18, %v1136_v43 }
 0x361   : > { %v1249_v23 = vsel %vm1223_vm0, %v1220_v21, 0.0 }
 0x362   : > { %v1139_v29 = vpop.xlane.xlu0 %1138  ;;  %v1250_v45 = vadd.f32 %v1249_v23, %v1248_v60 }
 0x363   : > { %v1221_v62 = vadd.f32 %v1204_v22, %v1139_v29 }
 0x365   : > { %v1251_v40 = vsel %vm1223_vm0, %v1221_v62, 0.0 }
 0x366   : > { %v1142_v58 = vpop.xlane.xlu0 %1141  ;;  %v1252_v63 = vadd.f32 %v1251_v40, %v1250_v45 }
 0x367   : > { %v1222_v35 = vadd.f32 %v1206_v42, %v1142_v58 }
 0x369   : > { %v1253_v41 = vsel %vm1223_vm0, %v1222_v35, 0.0 }
 0x36a   : > { %v1254_v59 = vadd.f32 %v1253_v41, %v1252_v63 }
 0x36c   : > { %1255 = vadd.xlane.f32.xlu0 %v1254_v59 }
 0x3f9   : > { %v1256_v16 = vpop.xlane.xlu0 %1255 }
 0x3fa   : > { %v1257_v25 = vrot.slane %v1256_v16, 4 }
 0x3fc   : > { %v1258_v34 = vadd.f32 %v1257_v25, %v1256_v16 }
 0x3fe   : > { %v1259_v9 = vrot.slane %v1258_v34, 2 }
 0x400   : > { %v1260_v15 = vadd.f32 %v1259_v9, %v1258_v34 }
 0x402   : > { %v1261_v55 = vrot.slane %v1260_v15, 1 }
 0x404   : > { %v1262_v19 = vadd.f32 %v1261_v55, %v1260_v15 }
 0x406   : > { %1439 = vpush %v1262_v19 }
 0x437   : > { %s1440_s11 = spop %1439 }
 0x438   : > { %s1264_s16 = smul.f32 0.5, %s1440_s11 }
 0x43a   : > { %v1265_v36 = vstv %s1264_s16 }
 0x43b   : > { %1267 = vst.msk [vmem:[%s339_s30] sm:$0x1] %vm1266_vm1, %v1265_v36 }
 0x43c PF: > { %p20_p12 = scmp.ge.s32.totalorder %s1922_s15, 4   ;;  %s2480_s21 = smov %s1769_s22 }
 0x43d   : > { %s2481_s22 = smov %s1773_s23  ;;  %s2482_s23 = smov %s1935_s20 }
 0x43e   : > { %s2483_s24 = smov %s1922_s15  ;;  %22 = sbr.rel (!%p20_p12) target bundleno = 8 (0x8), region = 105 }
 0x445   :  { %1285 = vsyncpa [#allocation3], 1 }
 0x446   :  { %1287 = vsyncpa [#allocation3 + $0x1], 1 }
 0x447   :  { %1288 = vsyncpa [#allocation5], 1 }
 0x448   :  { %1290 = vsyncpa [#allocation5 + $0x1], 1 }
 0x449   :  { %1291 = vsyncpa [#allocation8], 1 }

</bundles_post_ra>
